<compile_context>
chip_gen: v7x
topology: tpu7x:2x2x1
jax: 0.10.0
libtpu: 0.0.40
codegen_flags: <defaults>
</compile_context>

<pallas_src>
import functools

import numpy as np
import jax
import jax.numpy as jnp
from jax.experimental import pallas as pl
from jax.experimental.pallas import tpu as pltpu

# args.* hyper-parameters from the module __init__ (temperature/base_temperature
# are not used by the forward pass; kept for parity).
PROTOSIM_TEMP = 0.07
PROTOSIM_BASE_TEMP = 0.07
PROTOSIM_DENS_TEMP = 0.1

_NEG_BIG = -1e30


def _round_up(x, m):
    return ((x + m - 1) // m) * m


def _tpu_vmem_bytes(default=64 * 1024 * 1024):
    """Physical VMEM capacity (falls back to the v7x-safe 64 MiB)."""
    try:
        info = pltpu.get_tpu_info()
        v = getattr(info, "vmem_capacity_bytes", None)
        if v:
            return int(v)
    except Exception:
        pass
    return default


def _choose_row_tile(n, d_pad, k_pad, vmem_bytes, op_bytes, align=16):
    """Sublane-aligned row tile sized from the VMEM budget (512-1024 target)."""
    # resident: centroid block (plus headroom) + small invariant rows/columns
    resident = 3 * k_pad * d_pad * 4 + 32 * k_pad * 4
    budget = max(int(vmem_bytes * 0.6) - resident, 2 * 1024 * 1024)
    # per-row VMEM: double-buffered F tile + (tile,K) f32 intermediates + ints
    per_row = 2 * d_pad * op_bytes + 3 * k_pad * 4 + 32
    max_tile = 1024 if vmem_bytes >= 96 * 1024 * 1024 else 512
    tile = min(max_tile, max(align, (budget // per_row) // align * align))
    n_al = _round_up(max(n, 1), align)
    if n_al <= tile:
        return n_al, n_al
    return tile, _round_up(n, tile)


# --------------------------------------------------------------------------- #
# Kernel A: per-(subject,label) centroids.  Grid over row tiles, the centroid
# output is resident across the (arbitrary) reduction axis.  The one-hot group
# matrix is rebuilt in-register from the int32 group-index column.
# --------------------------------------------------------------------------- #
def _centroid_kernel(f_ref, gid_ref, invcnt_ref, cen_ref, *, matmul_dtype):
    i = pl.program_id(0)

    @pl.when(i == 0)
    def _init():
        cen_ref[...] = jnp.zeros_like(cen_ref)

    tile_n = f_ref.shape[0]
    k_pad = cen_ref.shape[0]
    gid = gid_ref[...]                                            # (tile_n, 1) int32
    onehot = (jax.lax.broadcasted_iota(jnp.int32, (tile_n, k_pad), 1)
              == gid).astype(matmul_dtype)                        # exact, in-register
    f = f_ref[...].astype(matmul_dtype)
    # (K, D) += onehot^T @ F_tile   (contract over rows)
    cen_ref[...] += jax.lax.dot_general(
        onehot, f, (((0,), (0,)), ((), ())), preferred_element_type=jnp.float32)

    @pl.when(i == pl.num_programs(0) - 1)
    def _finalize():
        cen_ref[...] = cen_ref[...] * invcnt_ref[...]   # (K,1) host-inverted counts


# --------------------------------------------------------------------------- #
# Kernel B: density statistics only (fc is NOT materialized).  Exact per-row
# distance to the row's own centroid via the in-register one-hot gather.
# --------------------------------------------------------------------------- #
def _density_kernel(f_ref, gid_ref, scale_ref, cen_ref, dens_ref, *, matmul_dtype):
    i = pl.program_id(0)
    f32 = jnp.float32
    tile_n = f_ref.shape[0]
    k_pad = cen_ref.shape[0]

    gid = gid_ref[...]                                            # (tile_n, 1)
    onehot = jax.lax.broadcasted_iota(jnp.int32, (tile_n, k_pad), 1) == gid

    # exact per-row centroid gather (no norm-expansion cancellation)
    c_row = jax.lax.dot_general(onehot.astype(matmul_dtype),
                                cen_ref[...].astype(matmul_dtype),
                                (((1,), (0,)), ((), ())),
                                preferred_element_type=f32)        # (tile_n, D)
    diff = f_ref[...].astype(f32) - c_row
    d2 = jnp.sum(diff * diff, axis=1, keepdims=True)               # (tile_n, 1)
    q = jnp.sqrt(jnp.sqrt(d2))                                     # dist**0.5

    @pl.when(i == 0)
    def _init():
        dens_ref[...] = jnp.zeros_like(dens_ref)

    # per-group sum of dist**0.5 (padded rows have gid=-1 -> zero one-hot row)
    dens_ref[...] += jnp.sum(onehot.astype(f32) * q, axis=0, keepdims=True)

    @pl.when(i == pl.num_programs(0) - 1)
    def _finalize():
        # * 1/(cnt * log(cnt+10)), pre-inverted on host
        dens_ref[...] = dens_ref[...] * scale_ref[...]


# --------------------------------------------------------------------------- #
# Kernel C: masked soft-label cross entropy, reduced in-kernel to one scalar.
# Recomputes the (tile, K) logits from F / centroids (no fc round-trip, no
# gather) and rebuilds the mask + column padding in-register.
# --------------------------------------------------------------------------- #
def _loss_kernel(f_ref, rsub_ref, rlab_ref, cen_ref, invdens_ref,
                 gsub_ref, glab_ref, loss_ref, *, matmul_dtype, k_real):
    i = pl.program_id(0)
    f32 = jnp.float32
    k_pad = cen_ref.shape[0]

    @pl.when(i == 0)
    def _init():
        loss_ref[...] = jnp.zeros_like(loss_ref)

    # logits numerator: (tile_n, K) = F_tile @ C^T
    fc = jax.lax.dot_general(f_ref[...].astype(matmul_dtype),
                             cen_ref[...].astype(matmul_dtype),
                             (((1,), (1,)), ((), ())),
                             preferred_element_type=f32)

    col = jax.lax.broadcasted_iota(jnp.int32, (1, k_pad), 1)
    valid = col < k_real                                           # real columns
    neg = jnp.where(valid, 0.0, _NEG_BIG).astype(f32)              # (1, K)

    # positive mask rebuilt in-register: cross-subject AND same-label.
    # padded rows carry subject/label = -1 -> mask row is all zero -> weight 0.
    m = ((rsub_ref[...] != gsub_ref[...])
         & (rlab_ref[...] == glab_ref[...])
         & valid).astype(f32)                                      # (tile_n, K)

    sim = fc * invdens_ref[...] + neg          # padded cols excluded from row max
    sim = sim - jnp.max(sim, axis=1, keepdims=True)
    ps = sim * m + neg                         # padded cols excluded from the lse
    # max(ps) == 0 by construction -> single-pass log-sum-exp
    lse = jnp.log(jnp.sum(jnp.exp(ps), axis=1, keepdims=True))
    ce = -jnp.sum(m * (ps - lse), axis=1, keepdims=True)           # (tile_n, 1)

    msum = jnp.sum(m, axis=1, keepdims=True)
    w = jnp.where(msum > 0.0, 1.0 / jnp.maximum(msum, 1.0), 0.0)   # 0 for excluded rows
    loss_ref[...] += jnp.sum(ce * w, keepdims=True)


# --------------------------------------------------------------------------- #
# Wrapper
# --------------------------------------------------------------------------- #
def proto_sim_loss_intra_class(x_data, subject, labels,
                               dens_temperature=PROTOSIM_DENS_TEMP,
                               matmul_dtype=jnp.bfloat16):
    """Forward pass of ProtoSimLoss_intra_calss.

    x_data : (B, V, D) float32, V == 2 (the reference cat's subject twice).
    subject, labels : (B,) host integer arrays — data-dependent group structure
        fixes the static kernel shapes.
    matmul_dtype : jnp.bfloat16 (default fast MXU path, f32 accumulation and
        f32 elementwise/softmax) or jnp.float32 (exact parity with the f64 ref).
    """
    x_data = jnp.asarray(x_data, jnp.float32)
    B, V, D = x_data.shape
    assert V == 2, "reference module hardcodes two views"

    subject_np = np.asarray(subject).reshape(-1)
    labels_np = np.asarray(labels).reshape(-1)
    subject_ten = np.concatenate([subject_np, subject_np])
    labels_ten = np.concatenate([labels_np, labels_np])
    N = V * B

    # ---- host glue: data-dependent (subject,label) group discovery ---------
    # TODO(synk): torch.unique-driven group enumeration is data dependent; it is
    # done on host and only the dense numeric work runs in the Pallas kernels.
    subject_list, labels_list, group_rows = [], [], []
    for i, sub in enumerate(np.unique(subject_ten)):
        sel = subject_ten == sub
        for j, lab in enumerate(np.unique(labels_ten[sel])):
            rows = np.where(sel & (labels_ten == lab))[0]
            group_rows.append(rows)
            subject_list.append(i)
            labels_list.append(j)
    K = len(group_rows)
    counts = np.array([len(r) for r in group_rows], np.float64)
    subj_arr = np.asarray(subject_list)
    lab_arr = np.asarray(labels_list)

    # M = number of rows with a nonzero positive mask (needed for the final mean);
    # the dense mask itself is NOT shipped to the device anymore.
    sm = np.tile(subject_np.reshape(-1, 1) != subj_arr, (V, 1))
    lm = np.tile(labels_np.reshape(-1, 1) == lab_arr, (V, 1))
    M = int(np.count_nonzero((sm & lm).sum(1)))

    # ---- static lane/sublane-friendly padding & tile plan --------------------
    D_pad = _round_up(D, 128)
    K_pad = _round_up(K, 128)
    vmem_bytes = _tpu_vmem_bytes()
    op_bytes = jnp.dtype(matmul_dtype).itemsize
    tile_n, N_pad = _choose_row_tile(N, D_pad, K_pad, vmem_bytes, op_bytes)
    grid_n = N_pad // tile_n
    vmem_limit = min((vmem_bytes * 3) // 4, 96 * 1024 * 1024)

    # small per-row / per-group int32 columns replacing the dense G / mask
    gid = np.full((N_pad, 1), -1, np.int32)
    for k, rows in enumerate(group_rows):
        gid[rows, 0] = k
    row_sub = np.full((N_pad, 1), -1, np.int32)
    row_lab = np.full((N_pad, 1), -1, np.int32)
    row_sub[:N, 0] = subject_ten.astype(np.int64)
    row_lab[:N, 0] = labels_ten.astype(np.int64)
    gsub = np.full((1, K_pad), -1, np.int32)
    glab = np.full((1, K_pad), -1, np.int32)
    gsub[0, :K] = subj_arr
    glab[0, :K] = lab_arr

    inv_cnt = np.ones((K_pad, 1), np.float32)
    inv_cnt[:K, 0] = 1.0 / counts
    scale = np.ones((1, K_pad), np.float32)
    scale[0, :K] = 1.0 / (counts * np.log(counts + 10.0))

    # contrast_feature = torch.cat(torch.unbind(X, dim=1), dim=0) -> (V*B, D),
    # zero-padded to lane-dense (N_pad, D_pad); zero padding is exact.
    contrast_feature = jnp.transpose(x_data, (1, 0, 2)).reshape(N, D)
    f_pad = jnp.zeros((N_pad, D_pad), jnp.float32).at[:N, :D].set(contrast_feature)
    f_in = f_pad.astype(matmul_dtype)

    # TODO(synk): on v7x the row-tile axis could be made 'parallel' (per-tile
    # partial dens/loss outputs reduced in XLA) to use both TensorCores; kept
    # 'arbitrary' resident accumulators here for v5e/v6e simplicity.
    cparams = pltpu.CompilerParams(dimension_semantics=("arbitrary",),
                                   vmem_limit_bytes=int(vmem_limit))

    # ---- Kernel A: centroids -------------------------------------------------
    cen = pl.pallas_call(
        functools.partial(_centroid_kernel, matmul_dtype=matmul_dtype),
        out_shape=jax.ShapeDtypeStruct((K_pad, D_pad), jnp.float32),
        grid=(grid_n,),
        in_specs=[
            pl.BlockSpec((tile_n, D_pad), lambda i: (i, 0)),
            pl.BlockSpec((tile_n, 1), lambda i: (i, 0)),
            pl.BlockSpec((K_pad, 1), lambda i: (0, 0)),
        ],
        out_specs=pl.BlockSpec((K_pad, D_pad), lambda i: (0, 0)),
        compiler_params=cparams,
    )(f_in, jnp.asarray(gid), jnp.asarray(inv_cnt))

    # ---- Kernel B: raw density (fc not materialized) -------------------------
    dens_raw = pl.pallas_call(
        functools.partial(_density_kernel, matmul_dtype=matmul_dtype),
        out_shape=jax.ShapeDtypeStruct((1, K_pad), jnp.float32),
        grid=(grid_n,),
        in_specs=[
            pl.BlockSpec((tile_n, D_pad), lambda i: (i, 0)),
            pl.BlockSpec((tile_n, 1), lambda i: (i, 0)),
            pl.BlockSpec((1, K_pad), lambda i: (0, 0)),
            pl.BlockSpec((K_pad, D_pad), lambda i: (0, 0)),
        ],
        out_specs=pl.BlockSpec((1, K_pad), lambda i: (0, 0)),
        compiler_params=cparams,
    )(f_in, jnp.asarray(gid), jnp.asarray(scale), cen)

    # ---- JAX glue: density post-processing (quantile clip + normalize) -------
    # TODO(synk): the K-element quantile clip is data-dependent ordering work;
    # it stays in plain JAX between the two kernels.
    counts_j = jnp.asarray(counts.astype(np.float32))
    dens = dens_raw[0, :K]
    dens = jnp.where(counts_j > 1, dens, 0.0)
    dmax = jnp.max(dens)
    dens = jnp.where(counts_j > 1, dens, dmax)
    dens = jnp.clip(dens, jnp.quantile(dens, 0.1), jnp.quantile(dens, 0.9))
    dens = dens_temperature * dens / jnp.mean(dens)
    dens = jnp.maximum(dens, 1e-12)              # guard against divide-by-zero
    inv_dens = jnp.ones((1, K_pad), jnp.float32).at[0, :K].set(1.0 / dens)

    # ---- Kernel C: masked soft-label cross entropy -> scalar loss ------------
    loss_acc = pl.pallas_call(
        functools.partial(_loss_kernel, matmul_dtype=matmul_dtype, k_real=K),
        out_shape=jax.ShapeDtypeStruct((1, 1), jnp.float32),
        grid=(grid_n,),
        in_specs=[
            pl.BlockSpec((tile_n, D_pad), lambda i: (i, 0)),
            pl.BlockSpec((tile_n, 1), lambda i: (i, 0)),
            pl.BlockSpec((tile_n, 1), lambda i: (i, 0)),
            pl.BlockSpec((K_pad, D_pad), lambda i: (0, 0)),
            pl.BlockSpec((1, K_pad), lambda i: (0, 0)),
            pl.BlockSpec((1, K_pad), lambda i: (0, 0)),
            pl.BlockSpec((1, K_pad), lambda i: (0, 0)),
        ],
        out_specs=pl.BlockSpec((1, 1), lambda i: (0, 0)),
        compiler_params=cparams,
    )(f_in, jnp.asarray(row_sub), jnp.asarray(row_lab), cen, inv_dens,
      jnp.asarray(gsub), jnp.asarray(glab))

    # loss.view(contrast_count, M // 2).mean() == sum_i ce_i / (msum_i) / M
    # TODO(synk): reference produces NaN for M == 0 (mean over empty); we return 0.
    inv_m = (1.0 / M) if M > 0 else 0.0
    return loss_acc[0, 0] * inv_m


# --------------------------------------------------------------------------- #
# Pure numpy reference of the PyTorch forward (float64), for checking.
# --------------------------------------------------------------------------- #
def _reference_numpy(x_data, subject, labels, dens_temperature):
    x = np.asarray(x_data, np.float64)
    B, V, D = x.shape
    f = np.transpose(x, (1, 0, 2)).reshape(V * B, D)
    sub = np.asarray(subject).reshape(-1)
    lab = np.asarray(labels).reshape(-1)
    sub2 = np.concatenate([sub, sub])
    lab2 = np.concatenate([lab, lab])
    cents, dists, s_list, l_list = [], [], [], []
    for i, s in enumerate(np.unique(sub2)):
        sel = sub2 == s
        for j, l in enumerate(np.unique(lab2[sel])):
            rows = np.where(sel & (lab2 == l))[0]
            X = f[rows]
            c = X.mean(0)
            d = np.linalg.norm(X - c, axis=1)
            cents.append(c); dists.append(d); s_list.append(i); l_list.append(j)
    cents = np.stack(cents)
    K = len(dists)
    density = np.zeros(K)
    for i, d in enumerate(dists):
        if len(d) > 1:
            density[i] = np.mean(np.sqrt(d)) / np.log(len(d) + 10)
    dmax = density.max()
    for i, d in enumerate(dists):
        if len(d) <= 1:
            density[i] = dmax
    density = np.clip(density, np.quantile(density, 0.1), np.quantile(density, 0.9))
    density = dens_temperature * density / density.mean()
    sm = (sub.reshape(-1, 1) == np.asarray(s_list)).astype(np.float64)
    sm = np.where(sm == 1, 0.0, 1.0)
    sm = np.tile(sm, (V, 1))
    lm = (lab.reshape(-1, 1) == np.asarray(l_list)).astype(np.float64)
    lm = np.tile(lm, (V, 1))
    mask = sm * lm
    nz = np.where(mask.sum(1) != 0)[0]
    mask = mask[nz]
    sim = f @ cents.T / density
    sim = sim - sim.max(1, keepdims=True)
    sim = sim[nz]
    ps = sim * mask
    pmx = ps.max(1, keepdims=True)
    lse = pmx + np.log(np.exp(ps - pmx).sum(1, keepdims=True))
    loss = -(mask * (ps - lse)).sum(1) / mask.sum(1)
    return loss.reshape(V, -1).mean()


if __name__ == "__main__":
    key = jax.random.PRNGKey(0)
    B, V, D = 8, 2, 32
    x = jax.random.normal(key, (B, V, D), dtype=jnp.float32)
    subject = np.array([0, 0, 0, 0, 1, 1, 1, 1], np.int32)
    labels = np.array([0, 0, 1, 1, 0, 0, 1, 1], np.int32)

    ref = _reference_numpy(np.asarray(x), subject, labels, PROTOSIM_DENS_TEMP)

    # f32 MXU path: exact parity with the float64 reference.
    loss_f32 = proto_sim_loss_intra_class(x, subject, labels,
                                          matmul_dtype=jnp.float32)
    loss_f32 = jax.block_until_ready(loss_f32)
    np.testing.assert_allclose(float(loss_f32), float(ref), rtol=1e-3, atol=1e-3)

    # Default bf16 MXU-operand path (perf default for v6e/v7x): smoke test.
    loss_bf16 = proto_sim_loss_intra_class(x, subject, labels)
    loss_bf16 = jax.block_until_ready(loss_bf16)
    assert np.isfinite(float(loss_bf16))

    print("KERNEL_OK")
</pallas_src>

<mosaic_0001>
module attributes {stable_mosaic.version = 11 : i64} {
  func.func @_centroid_kernel(%arg0: i32, %arg1: memref<16x128xf32, #tpu.memory_space<vmem>>, %arg2: memref<16x1xi32, #tpu.memory_space<vmem>>, %arg3: memref<128x1xf32, #tpu.memory_space<vmem>>, %arg4: memref<128x128xf32, #tpu.memory_space<vmem>>) attributes {dimension_semantics = [#tpu.dimension_semantics<arbitrary>], iteration_bounds = array<i64: 1>, scalar_prefetch = 0 : i64, scratch_operands = 0 : i64, tpu.core_type = #tpu.core_type<tc>, window_params = [{transform_indices = @transform_0, window_bounds = array<i64: 16, 128>}, {transform_indices = @transform_1, window_bounds = array<i64: 16, 1>}, {pipeline_mode = #tpu.pipeline_mode<synchronous>, transform_indices = @transform_2, window_bounds = array<i64: 128, 1>}, {pipeline_mode = #tpu.pipeline_mode<synchronous>, transform_indices = @transform_3, window_bounds = array<i64: 128, 128>}]} {
    %c0_i32 = arith.constant 0 : i32
    %0 = arith.cmpi eq, %arg0, %c0_i32 : i32
    %1 = arith.extui %0 : i1 to i32
    %c0_i32_0 = arith.constant 0 : i32
    %2 = arith.cmpi ne, %1, %c0_i32_0 : i32
    scf.if %2 {
      %cst_10 = arith.constant 0.000000e+00 : f32
      %17 = vector.broadcast %cst_10 : f32 to vector<128x128xf32>
      %c0_11 = arith.constant 0 : index
      %c0_12 = arith.constant 0 : index
      %18 = vector.load %arg4[%c0_11, %c0_12] : memref<128x128xf32, #tpu.memory_space<vmem>>, vector<128x128xf32>
      tpu.vector_store %arg4[%c0_11, %c0_12], %17 {strides = array<i32>} : memref<128x128xf32, #tpu.memory_space<vmem>>, vector<128x128xf32>,
    } else {
    }
    %c0 = arith.constant 0 : index
    %c0_1 = arith.constant 0 : index
    %3 = vector.load %arg2[%c0, %c0_1] : memref<16x1xi32, #tpu.memory_space<vmem>>, vector<16x1xi32>
    %4 = tpu.iota {dimensions = array<i32: 1>} : vector<16x128xi32>
    %5 = vector.broadcast %3 : vector<16x1xi32> to vector<16x128xi32>
    %6 = arith.cmpi eq, %4, %5 : vector<16x128xi32>
    %7 = arith.extui %6 : vector<16x128xi1> to vector<16x128xi32>
    %8 = arith.sitofp %7 : vector<16x128xi32> to vector<16x128xf32>
    %c0_2 = arith.constant 0 : index
    %c0_3 = arith.constant 0 : index
    %9 = vector.load %arg1[%c0_2, %c0_3] : memref<16x128xf32, #tpu.memory_space<vmem>>, vector<16x128xf32>
    %c0_4 = arith.constant 0 : index
    %c0_5 = arith.constant 0 : index
    %10 = vector.load %arg4[%c0_4, %c0_5] : memref<128x128xf32, #tpu.memory_space<vmem>>, vector<128x128xf32>
    %cst = arith.constant dense<0.000000e+00> : vector<128x128xf32>
    %11 = tpu.matmul %8, %9, %cst {dimension_numbers = #tpu.dot_dimension_numbers<[0], [0], [1], [1], [0, 1, 1, 1], [], []>} : vector<16x128xf32>, vector<16x128xf32>, vector<128x128xf32> -> vector<128x128xf32>
    %12 = arith.addf %10, %11 : vector<128x128xf32>
    %c0_6 = arith.constant 0 : index
    %c0_7 = arith.constant 0 : index
    %13 = vector.load %arg4[%c0_6, %c0_7] : memref<128x128xf32, #tpu.memory_space<vmem>>, vector<128x128xf32>
    tpu.vector_store %arg4[%c0_6, %c0_7], %12 {strides = array<i32>} : memref<128x128xf32, #tpu.memory_space<vmem>>, vector<128x128xf32>,
    %c0_i32_8 = arith.constant 0 : i32
    %14 = arith.cmpi eq, %arg0, %c0_i32_8 : i32
    %15 = arith.extui %14 : i1 to i32
    %c0_i32_9 = arith.constant 0 : i32
    %16 = arith.cmpi ne, %15, %c0_i32_9 : i32
    scf.if %16 {
      %c0_10 = arith.constant 0 : index
      %c0_11 = arith.constant 0 : index
      %17 = vector.load %arg4[%c0_10, %c0_11] : memref<128x128xf32, #tpu.memory_space<vmem>>, vector<128x128xf32>
      %c0_12 = arith.constant 0 : index
      %c0_13 = arith.constant 0 : index
      %18 = vector.load %arg3[%c0_12, %c0_13] : memref<128x1xf32, #tpu.memory_space<vmem>>, vector<128x1xf32>
      %19 = vector.broadcast %18 : vector<128x1xf32> to vector<128x128xf32>
      %20 = arith.mulf %17, %19 : vector<128x128xf32>
      %c0_14 = arith.constant 0 : index
      %c0_15 = arith.constant 0 : index
      %21 = vector.load %arg4[%c0_14, %c0_15] : memref<128x128xf32, #tpu.memory_space<vmem>>, vector<128x128xf32>
      tpu.vector_store %arg4[%c0_14, %c0_15], %20 {strides = array<i32>} : memref<128x128xf32, #tpu.memory_space<vmem>>, vector<128x128xf32>,
    } else {
    }
    return
  }
  func.func @transform_0(%arg0: i32) -> (i32, i32) {
    %c0_i32 = arith.constant 0 : i32
    %c0_i32_0 = arith.constant 0 : i32
    return %arg0, %c0_i32 : i32, i32
  }
  func.func @transform_1(%arg0: i32) -> (i32, i32) {
    %c0_i32 = arith.constant 0 : i32
    %c0_i32_0 = arith.constant 0 : i32
    return %arg0, %c0_i32 : i32, i32
  }
  func.func @transform_2(%arg0: i32) -> (i32, i32) {
    %c0_i32 = arith.constant 0 : i32
    %c0_i32_0 = arith.constant 0 : i32
    %c0_i32_1 = arith.constant 0 : i32
    return %c0_i32, %c0_i32_0 : i32, i32
  }
  func.func @transform_3(%arg0: i32) -> (i32, i32) {
    %c0_i32 = arith.constant 0 : i32
    %c0_i32_0 = arith.constant 0 : i32
    %c0_i32_1 = arith.constant 0 : i32
    return %c0_i32, %c0_i32_0 : i32, i32
  }
}

</mosaic_0001>

<bundles_post_ra>
// kernel: tpu_custom_call.1
= control target key start
LH: loop header
LB: loop body
LE: loop exit
PB: predicated region body
PF: predicated region fallthrough
CT: control target
= control target key end

     0   :  { %v591_v1 = vmov 0   ;;  %s704_s0 = inlined_call_operand.vmem [shape: f32[16,128], index: 0, kind: input, shape index: {}]   ;;  %s705_s1 = inlined_call_operand.vmem [shape: s32[16,1], index: 1, kind: input, shape index: {}]   ;;  %s706_s2 = inlined_call_operand.vmem [shape: f32[128,1], index: 2, kind: input, shape index: {}]   ;;  %s707_s3 = inlined_call_operand.hbm [shape: f32[128,128], index: 3, kind: output, shape index: {}]  }
   0x1   :  { %v35_v0 = vld [vmem:[%s705_s1] sm:$0xff]  ;;  %565 = vset.pattern.permute.xlu0 %v591_v1  ;;  %v36_v2 = vld [vmem:[%s705_s1 + $0x8] sm:$0xff] }
   0x2   :  { %40 = vperm.xlu0 %565, %v35_v0  }
   0x3   :  { %8 = vsyncpa [#allocation3], 0  ;;  %v346_v3 = vld [vmem:[%s706_s2] sm:$0xff]  ;;  %v348_v4 = vld [vmem:[%s706_s2 + $0x10] sm:$0xff]  ;;  %v37_v18 = vlaneseq  ;;  %v592_v23 = vmov 0.0   ;;  %vm101_vm2 = vcmask 130048  }
   0x4   :  { %v349_v5 = vld [vmem:[%s706_s2 + $0x18] sm:$0xff]  ;;  %v350_v6 = vld [vmem:[%s706_s2 + $0x20] sm:$0xff]  ;;  %v351_v7 = vld [vmem:[%s706_s2 + $0x28] sm:$0xff] }
   0x5   :  { %v352_v8 = vld [vmem:[%s706_s2 + $0x30] sm:$0xff]  ;;  %v353_v9 = vld [vmem:[%s706_s2 + $0x38] sm:$0xff]  ;;  %v354_v10 = vld [vmem:[%s706_s2 + $0x40] sm:$0xff]  ;;  %v38_v19 = vand.u32 127, %v37_v18 }
   0x6   :  { %43 = vperm.xlu0 %565, %v36_v2   ;;  %v355_v11 = vld [vmem:[%s706_s2 + $0x48] sm:$0xff]  ;;  %v356_v12 = vld [vmem:[%s706_s2 + $0x50] sm:$0xff]  ;;  %v357_v13 = vld [vmem:[%s706_s2 + $0x58] sm:$0xff] }
   0x7   :  { %v358_v14 = vld [vmem:[%s706_s2 + $0x60] sm:$0xff]  ;;  %v359_v15 = vld [vmem:[%s706_s2 + $0x68] sm:$0xff]  ;;  %v360_v16 = vld [vmem:[%s706_s2 + $0x70] sm:$0xff] }
   0x8   :  { %v361_v17 = vld [vmem:[%s706_s2 + $0x78] sm:$0xff]  ;;  %v51_v21 = vld [vmem:[%s704_s0] sm:$0xff]  ;;  %v52_v22 = vld [vmem:[%s704_s0 + $0x8] sm:$0xff]  ;;  %s593_s0 = smov [#allocation2]  }
   0x9   :  { %v554_v25 = vpack.c.bf16 %v52_v22, %v51_v21  ;;  %v347_v28 = vld [vmem:[%s706_s2 + $0x8] sm:$0xff]  ;;  %s479_s2 = sshll.u32 %s593_s0, 4  ;;  %s480_s2 = int_to_ptr.vmem [resolvable:$true] %s479_s2 }
   0xa   :  { %364 = vperm.xlu0 %565, %v346_v3   ;;  %s567_s1 = scalar_lea.vmem %s480_s2, 2048  ;;  %p572_p1 = scmp.lt.s32.totalorder %s480_s2, %s480_s2 }
   0xb   :  { %555 = vmatprep.subr.bf16.mxu0 %v554_v25  ;;  %558 = vmatprep.subr.bf16.mxu1 %v554_v25  ;;  %p568_p0 = scmp.ne.s32.totalorder %s480_s2, %s567_s1  ;;  %p573_p2 = scmp.lt.s32.totalorder %s567_s1, %s567_s1 }
   0xc   :  { %557 = vmatpush3.bf16.msra.mxu0 %v554_v25  ;;  %559 = vmatpush3.bf16.msra.mxu1 %v554_v25 }
   0xd   :  { %p574_p3 = por %p573_p2, %p572_p1 }
   0xe   :  { %374 = vperm.xlu0 %565, %v348_v4  }
   0xf   :  { %p575_p4 = pnand %p574_p3, %p568_p0 }
  0x12   :  { %379 = vperm.xlu0 %565, %v349_v5  }
  0x16   :  { %384 = vperm.xlu0 %565, %v350_v6  }
  0x1a   :  { %389 = vperm.xlu0 %565, %v351_v7  }
  0x1e   :  { %394 = vperm.xlu0 %565, %v352_v8  }
  0x22   :  { %399 = vperm.xlu0 %565, %v353_v9  }
  0x26   :  { %404 = vperm.xlu0 %565, %v354_v10  }
  0x2a   :  { %409 = vperm.xlu0 %565, %v355_v11  }
  0x2e   :  { %414 = vperm.xlu0 %565, %v356_v12  }
  0x32   :  { %419 = vperm.xlu0 %565, %v357_v13  }
  0x36   :  { %424 = vperm.xlu0 %565, %v358_v14  }
  0x3a   :  { %429 = vperm.xlu0 %565, %v359_v15  }
  0x3e   :  { %434 = vperm.xlu0 %565, %v360_v16  }
  0x42   :  { %439 = vperm.xlu0 %565, %v361_v17  }
  0x81   :  { %v41_v20 = vpop.permute.xlu0 %40 }
  0x82   :  { %vm45_vm0 = vcmp.eq.s32.totalorder %v38_v19, %v41_v20 }
  0x83   :  { %v490_v24 = vsel %vm45_vm0, 1.0, %v592_v23 }
  0x84   :  { %69 = vxpose.xlu1.b32.start [1/2] (short) %v490_v24, 128 }
  0x85   :  { %v44_v26 = vpop.permute.xlu0 %43 }
  0x86   :  { %vm46_vm1 = vcmp.eq.s32.totalorder %v38_v19, %v44_v26 }
  0x87   :  { %v491_v27 = vsel %vm46_vm1, 1.0, %v592_v23 }
  0x88   :  { %70 = vxpose.xlu1.b32.end [2/2] (short) %v491_v27, 128 }
  0x89   :  { %v365_v45 = vpop.permute.xlu0 %364 }
  0x8d   :  { %v375_v46 = vpop.permute.xlu0 %374 }
  0x91   :  { %v380_v47 = vpop.permute.xlu0 %379 }
  0x95   :  { %v385_v48 = vpop.permute.xlu0 %384 }
  0x99   :  { %v390_v49 = vpop.permute.xlu0 %389 }
  0x9d   :  { %v395_v54 = vpop.permute.xlu0 %394 }
  0xa1   :  { %v400_v58 = vpop.permute.xlu0 %399 }
  0xa5   :  { %v405_v61 = vpop.permute.xlu0 %404 }
  0xa6   :  { %566 = vset.pattern.permute.xlu1 %v591_v1 }
  0xa9   :  { %v410_v2 = vpop.permute.xlu0 %409 }
  0xad   :  { %v415_v6 = vpop.permute.xlu0 %414 }
  0xb1   :  { %v420_v10 = vpop.permute.xlu0 %419 }
  0xb5   :  { %v425_v13 = vpop.permute.xlu0 %424 }
  0xb9   :  { %v430_v18 = vpop.permute.xlu0 %429 }
  0xbd   :  { %v435_v22 = vpop.permute.xlu0 %434 }
  0xc1   :  { %v440_v26 = vpop.permute.xlu0 %439 }
  0xde   :  { %369 = vperm.xlu1 %566, %v347_v28  }
 0x104   :  { %v85_v29 = vpop.trf.xlu1 }
 0x105   :  { %530 = vmatprep.mubr.msk.f32.mxu0 %vm101_vm2, %v85_v29 }
 0x108   :  { %v86_v30 = vpop.trf.xlu1 }
 0x109   :  { %531 = vmatmul.mubr.msk.f32.vlgmr.msra.gmra.mrb[0].mxu0 %vm101_vm2, %v86_v30 }
 0x10c   :  { %v87_v31 = vpop.trf.xlu1 }
 0x10d   :  { %533 = vmatprep.mubr.msk.f32.mxu0 %vm101_vm2, %v87_v31 }
 0x110   :  { %v88_v32 = vpop.trf.xlu1 }
 0x111   :  { %534 = vmatmul.mubr.msk.f32.gmra.mrb[2].mxu0 %vm101_vm2, %v88_v32 }
 0x114   :  { %v89_v33 = vpop.trf.xlu1 }
 0x115   :  { %536 = vmatprep.mubr.msk.f32.mxu0 %vm101_vm2, %v89_v33 }
 0x118   :  { %v90_v34 = vpop.trf.xlu1 }
 0x119   :  { %537 = vmatmul.mubr.msk.f32.gmra.mrb[4].mxu0 %vm101_vm2, %v90_v34 }
 0x11c   :  { %v91_v35 = vpop.trf.xlu1 }
 0x11d   :  { %539 = vmatprep.mubr.msk.f32.mxu0 %vm101_vm2, %v91_v35 }
 0x120   :  { %v92_v36 = vpop.trf.xlu1 }
 0x121   :  { %540 = vmatmul.mubr.msk.f32.gmra.mrb[6].mxu0 %vm101_vm2, %v92_v36 }
 0x124   :  { %v93_v37 = vpop.trf.xlu1 }
 0x125   :  { %542 = vmatprep.mubr.msk.f32.mxu1 %vm101_vm2, %v93_v37 }
 0x128   :  { %v94_v38 = vpop.trf.xlu1 }
 0x129   :  { %543 = vmatmul.mubr.msk.f32.vlgmr.msra.gmra.mrb[0].mxu1 %vm101_vm2, %v94_v38 }
 0x12c   :  { %v95_v39 = vpop.trf.xlu1 }
 0x12d   :  { %545 = vmatprep.mubr.msk.f32.mxu1 %vm101_vm2, %v95_v39 }
 0x130   :  { %v96_v40 = vpop.trf.xlu1 }
 0x131   :  { %546 = vmatmul.mubr.msk.f32.gmra.mrb[2].mxu1 %vm101_vm2, %v96_v40 }
 0x134   :  { %v97_v41 = vpop.trf.xlu1 }
 0x135   :  { %548 = vmatprep.mubr.msk.f32.mxu1 %vm101_vm2, %v97_v41 }
 0x138   :  { %v98_v42 = vpop.trf.xlu1 }
 0x139   :  { %549 = vmatmul.mubr.msk.f32.gmra.mrb[4].mxu1 %vm101_vm2, %v98_v42 }
 0x13c   :  { %v99_v43 = vpop.trf.xlu1 }
 0x13d   :  { %551 = vmatprep.mubr.msk.f32.mxu1 %vm101_vm2, %v99_v43 }
 0x140   :  { %v100_v44 = vpop.trf.xlu1 }
 0x141   :  { %552 = vmatmul.mubr.msk.f32.gmra.mrb[6].mxu1 %vm101_vm2, %v100_v44 }
 0x15d   :  { %v370_v51 = vpop.permute.xlu1 %369 }
 0x1dc   :  { %v532_v50 = vpop.f32.mrb[0].mxu0 }
 0x1dd   :  { %v216_v52 = vpop.f32.mrb[1].mxu0  ;;  %v443_v53 = vmul.f32 %v532_v50, %v370_v51 }
 0x1de   :  { %v442_v55 = vmul.f32 %v365_v45, %v216_v52 }
 0x1df   :  { %459 = vst [vmem:[#allocation2 + $0x8] sm:$0xff] %v443_v53 }
 0x1e0   :  { %458 = vst [vmem:[#allocation2] sm:$0xff] %v442_v55 }
 0x1e4   :  { %v535_v56 = vpop.f32.mrb[2].mxu0 }
 0x1e5   :  { %v226_v57 = vpop.f32.mrb[3].mxu0  ;;  %v445_v59 = vmul.f32 %v535_v56, %v380_v47 }
 0x1e6   :  { %v444_v60 = vmul.f32 %v375_v46, %v226_v57 }
 0x1e7   :  { %461 = vst [vmem:[#allocation2 + $0x18] sm:$0xff] %v445_v59 }
 0x1e8   :  { %460 = vst [vmem:[#allocation2 + $0x10] sm:$0xff] %v444_v60 }
 0x1ec   :  { %v538_v62 = vpop.f32.mrb[4].mxu0 }
 0x1ed   :  { %v236_v63 = vpop.f32.mrb[5].mxu0  ;;  %v447_v0 = vmul.f32 %v538_v62, %v390_v49 }
 0x1ee   :  { %v446_v1 = vmul.f32 %v385_v48, %v236_v63 }
 0x1ef   :  { %463 = vst [vmem:[#allocation2 + $0x28] sm:$0xff] %v447_v0 }
 0x1f0   :  { %462 = vst [vmem:[#allocation2 + $0x20] sm:$0xff] %v446_v1 }
 0x1f4   :  { %v541_v3 = vpop.f32.mrb[6].mxu0 }
 0x1f5   :  { %v246_v4 = vpop.f32.mrb[7].mxu0  ;;  %v449_v5 = vmul.f32 %v541_v3, %v400_v58 }
 0x1f6   :  { %v448_v7 = vmul.f32 %v395_v54, %v246_v4 }
 0x1f7   :  { %465 = vst [vmem:[#allocation2 + $0x38] sm:$0xff] %v449_v5 }
 0x1f8   :  { %464 = vst [vmem:[#allocation2 + $0x30] sm:$0xff] %v448_v7 }
 0x1fc   :  { %v544_v8 = vpop.f32.mrb[0].mxu1 }
 0x1fd   :  { %v256_v9 = vpop.f32.mrb[1].mxu1  ;;  %v451_v11 = vmul.f32 %v544_v8, %v410_v2 }
 0x1fe   :  { %v450_v12 = vmul.f32 %v405_v61, %v256_v9 }
 0x1ff   :  { %467 = vst [vmem:[#allocation2 + $0x48] sm:$0xff] %v451_v11 }
 0x200   :  { %466 = vst [vmem:[#allocation2 + $0x40] sm:$0xff] %v450_v12 }
 0x204   :  { %v547_v14 = vpop.f32.mrb[2].mxu1 }
 0x205   :  { %v266_v15 = vpop.f32.mrb[3].mxu1  ;;  %v453_v16 = vmul.f32 %v547_v14, %v420_v10 }
 0x206   :  { %v452_v17 = vmul.f32 %v415_v6, %v266_v15 }
 0x207   :  { %469 = vst [vmem:[#allocation2 + $0x58] sm:$0xff] %v453_v16 }
 0x208   :  { %468 = vst [vmem:[#allocation2 + $0x50] sm:$0xff] %v452_v17 }
 0x20c   :  { %v550_v19 = vpop.f32.mrb[4].mxu1 }
 0x20d   :  { %v276_v20 = vpop.f32.mrb[5].mxu1  ;;  %v455_v21 = vmul.f32 %v550_v19, %v430_v18 }
 0x20e   :  { %v454_v23 = vmul.f32 %v425_v13, %v276_v20 }
 0x20f   :  { %471 = vst [vmem:[#allocation2 + $0x68] sm:$0xff] %v455_v21 }
 0x210   :  { %470 = vst [vmem:[#allocation2 + $0x60] sm:$0xff] %v454_v23 }
 0x214   :  { %v553_v24 = vpop.f32.mrb[6].mxu1 }
 0x215   :  { %v286_v25 = vpop.f32.mrb[7].mxu1  ;;  %v457_v27 = vmul.f32 %v553_v24, %v440_v26 }
 0x216   :  { %v456_v28 = vmul.f32 %v435_v22, %v286_v25 }
 0x217   :  { %473 = vst [vmem:[#allocation2 + $0x78] sm:$0xff] %v457_v27 }
 0x218   :  { %472 = vst [vmem:[#allocation2 + $0x70] sm:$0xff] %v456_v28 }
 0x219   :  { %578 = shalt.err (!%p575_p4)
}
 0x21a   :  { %s579_s26 = scalar_lea.hbm %s707_s3, 2048 }
 0x21b   :  { %p580_p5 = scmp.ne.s32.totalorder %s707_s3, %s579_s26  ;;  %p583_p6 = scmp.lt.u32.totalorder %s579_s26, %s707_s3 }
 0x21d   :  { %p585_p7 = pnand %p583_p6, %p580_p5 }
 0x21f   :  { %588 = shalt.err (!%p585_p7)
}
 0x220   :  { %s594_s4 = smov 128   ;;  %s595_s5 = smov 8  }
 0x221   :  { %485 = dma.vmem_to_hbm [thread:$0]  %s480_s2, 2048, %s707_s3, [#allocation3], %s594_s4, %s594_s4, %s595_s5  }
 0x222   :  { %589 = dma.done.wait [#allocation3], 2048  }
 0x223   :  { %590 = vsyncadd [#allocation3], 4294965248 }
 0x224   :  { %489 = vsyncpa [#allocation3], 1 }

</bundles_post_ra>
